<compile_context>
chip_gen: v7x
topology: tpu7x:2x2x1
jax: 0.10.0
libtpu: 0.0.40
codegen_flags: <defaults>
</compile_context>

<pallas_src>
import functools

import jax
import jax.numpy as jnp
from jax.experimental import pallas as pl
from jax.experimental.pallas import tpu as pltpu

_LANE = 128
_EPS = 1e-12
_PER_BLOCK_VMEM_BUDGET = 4 * 1024 * 1024   # bytes per (lane-padded) block
_MIN_SPLIT_BLOCK_BYTES = 2 * 1024 * 1024   # never shrink below this when splitting
_VMEM_LIMIT_BYTES = 32 * 1024 * 1024       # explicit scoped-VMEM request (safe on v5e/v6e/v7x)


# ----------------------------------------------------------------------------
# Hardware / tiling helpers.
# ----------------------------------------------------------------------------
def _sublane_multiple(dtype):
    """Native packed-tile sublane multiple: 8 (f32), 16 (bf16/f16), 32 (int8/fp8)."""
    return max(8, 32 // jnp.dtype(dtype).itemsize)


def _padded_row_bytes(lane_width, dtype):
    """Bytes of one block row AFTER 128-lane padding (what VMEM actually holds)."""
    padded = pl.cdiv(lane_width, _LANE) * _LANE
    return padded * jnp.dtype(dtype).itemsize


def _num_tensorcores_per_chip():
    """v7x exposes 2 TensorCores per chip; v5e / v6e have 1."""
    try:
        kind = jax.devices()[0].device_kind.lower()
    except Exception:  # pragma: no cover - defensive
        return 1
    return 2 if ("v7" in kind or "tpu7" in kind) else 1


def _round_up(x, m):
    return ((x + m - 1) // m) * m


def _choose_tile_rows(rows, row_bytes, sublane, n_cores):
    """Rows per block: biggest that fits the budget, sublane-aligned.

    On multi-TC chips only, shrink toward >= 2*n_cores programs, but never
    below ~2 MiB blocks (halving blocks on single-TC chips is pure loss).
    """
    if rows <= sublane:
        return rows                                   # block == full dim is always legal
    fit = max(sublane, (_PER_BLOCK_VMEM_BUDGET // max(1, row_bytes)) // sublane * sublane)
    tile = fit
    if n_cores > 1:
        floor_rows = max(
            sublane, (_MIN_SPLIT_BLOCK_BYTES // max(1, row_bytes)) // sublane * sublane)
        target = _round_up(pl.cdiv(rows, 2 * n_cores), sublane)
        tile = min(tile, max(target, floor_rows))
    if tile >= rows:
        return rows
    return tile


def _compiler_params():
    return pltpu.CompilerParams(
        dimension_semantics=("parallel",),
        vmem_limit_bytes=_VMEM_LIMIT_BYTES)


# ----------------------------------------------------------------------------
# Kernels.
# ----------------------------------------------------------------------------
def _l2_normalize_rows_kernel(x_ref, o_ref):
    """Per-row L2 normalize; feature axis fully resident (feat >= 128 or unpackable)."""
    x = x_ref[...].astype(jnp.float32)
    ssq = jnp.sum(x * x, axis=-1, keepdims=True)      # XLU reduce
    o_ref[...] = (x * jax.lax.rsqrt(ssq + _EPS)).astype(o_ref.dtype)   # EUP rsqrt


def _l2_normalize_packed_kernel(x_ref, mask_ref, o_ref):
    """Lane-packed L2 normalize: each 128-lane row holds g logical rows.

    The group-sum (and its broadcast back over the group's lanes) is a single
    (tile,128)x(128,128) 0/1 block-diagonal matmul — the MXU is otherwise idle
    and this keeps every load/store lane-dense (unmasked).
    """
    x = x_ref[...].astype(jnp.float32)                 # (tile, 128), lane-dense
    ssq = jnp.dot(x * x, mask_ref[...], preferred_element_type=jnp.float32)
    o_ref[...] = (x * jax.lax.rsqrt(ssq + _EPS)).astype(o_ref.dtype)


def _l2_normalize_wide_kernel(x_ref, o_ref, ssq_ref, *, feat, feat_tile):
    """Feature-tiled two-pass L2 normalize for very wide rows.

    Grid = (row_tiles, 2, feat_tiles): pass 0 accumulates the sum of squares
    into a resident VMEM scratch, pass 1 re-reads the input tiles and writes
    the normalized output.
    """
    p = pl.program_id(1)   # 0: accumulate, 1: normalize + write
    k = pl.program_id(2)   # feature-tile index

    @pl.when((p == 0) & (k == 0))
    def _():
        ssq_ref[...] = jnp.zeros_like(ssq_ref)

    @pl.when(p == 0)
    def _():
        x = x_ref[...].astype(jnp.float32)
        # Mask lanes past the true feature width (partial last feature block).
        col = k * feat_tile + jax.lax.broadcasted_iota(jnp.int32, x.shape, 1)
        x = jnp.where(col < feat, x, 0.0)
        ssq_ref[...] += jnp.sum(x * x, axis=-1, keepdims=True)
        o_ref[...] = x_ref[...]   # pass-through write keeps an aliased buffer intact

    @pl.when(p == 1)
    def _():
        x = x_ref[...].astype(jnp.float32)
        inv = jax.lax.rsqrt(ssq_ref[...] + _EPS)
        o_ref[...] = (x * inv).astype(o_ref.dtype)


# ----------------------------------------------------------------------------
# Pallas wrappers.
# ----------------------------------------------------------------------------
def _l2_normalize_wide_pallas(x2d, *, donate_buffer=False, feat_tile=None):
    rows, feat = x2d.shape
    dtype = x2d.dtype
    itemsize = jnp.dtype(dtype).itemsize
    sublane = _sublane_multiple(dtype)
    tile_r = rows if rows <= sublane else sublane
    if feat_tile is None:
        feat_tile = max(_LANE,
                        (_PER_BLOCK_VMEM_BUDGET // max(1, tile_r * itemsize)) // _LANE * _LANE)
    feat_tile = min(feat_tile, feat)
    grid = (pl.cdiv(rows, tile_r), 2, pl.cdiv(feat, feat_tile))
    kernel = functools.partial(_l2_normalize_wide_kernel, feat=feat, feat_tile=feat_tile)
    return pl.pallas_call(
        kernel,
        out_shape=jax.ShapeDtypeStruct((rows, feat), dtype),
        grid=grid,
        in_specs=[pl.BlockSpec((tile_r, feat_tile), lambda i, p, k: (i, k))],
        out_specs=pl.BlockSpec((tile_r, feat_tile), lambda i, p, k: (i, k)),
        scratch_shapes=[pltpu.VMEM((tile_r, 1), jnp.float32)],
        input_output_aliases=({0: 0} if donate_buffer else {}),
        compiler_params=pltpu.CompilerParams(
            dimension_semantics=("parallel", "arbitrary", "arbitrary"),
            vmem_limit_bytes=_VMEM_LIMIT_BYTES),
    )(x2d)


def _l2_normalize_pallas(x2d, *, donate_buffer=False):
    rows, feat = x2d.shape
    dtype = x2d.dtype
    sublane = _sublane_multiple(dtype)
    n_cores = _num_tensorcores_per_chip()
    io_alias = {0: 0} if donate_buffer else {}

    # --- Narrow-feature path: fold g rows into the 128-lane axis (lane-dense I/O). ---
    if feat < _LANE and _LANE % feat == 0 and rows % (_LANE // feat) == 0:
        g = _LANE // feat
        packed_rows = rows // g
        x_packed = x2d.reshape(packed_rows, _LANE)            # metadata-only reshape
        row_bytes = _padded_row_bytes(_LANE, dtype)
        tile = _choose_tile_rows(packed_rows, row_bytes, sublane, n_cores)
        # Group-sum matrix M[a,b] = 1 iff lanes a,b belong to the same logical row.
        lanes = jnp.arange(_LANE, dtype=jnp.int32)
        mask = (lanes[:, None] // feat == lanes[None, :] // feat).astype(jnp.float32)
        out = pl.pallas_call(
            _l2_normalize_packed_kernel,
            out_shape=jax.ShapeDtypeStruct((packed_rows, _LANE), dtype),
            grid=(pl.cdiv(packed_rows, tile),),
            in_specs=[pl.BlockSpec((tile, _LANE), lambda i: (i, 0)),
                      pl.BlockSpec((_LANE, _LANE), lambda i: (0, 0))],  # resident mask
            out_specs=pl.BlockSpec((tile, _LANE), lambda i: (i, 0)),
            input_output_aliases=io_alias,
            compiler_params=_compiler_params(),
        )(x_packed, mask)
        return out.reshape(rows, feat)

    # --- General per-row path. ---
    row_bytes = _padded_row_bytes(feat, dtype)
    if sublane * row_bytes > _PER_BLOCK_VMEM_BUDGET:
        # Even a minimal block would blow the budget -> tile the feature axis too.
        return _l2_normalize_wide_pallas(x2d, donate_buffer=donate_buffer)

    tile = _choose_tile_rows(rows, row_bytes, sublane, n_cores)
    return pl.pallas_call(
        _l2_normalize_rows_kernel,
        out_shape=jax.ShapeDtypeStruct((rows, feat), dtype),
        grid=(pl.cdiv(rows, tile),),
        in_specs=[pl.BlockSpec((tile, feat), lambda i: (i, 0))],
        out_specs=pl.BlockSpec((tile, feat), lambda i: (i, 0)),
        input_output_aliases=io_alias,
        compiler_params=_compiler_params(),
    )(x2d)


# ----------------------------------------------------------------------------
# Module-equivalent forward.
# ----------------------------------------------------------------------------
def identity_embedder_forward(embeddings, out_features, *, normalizer=None,
                              head_normalize=True, donate_buffer=False):
    """Pallas/JAX implementation of _IdentityEmbedder.forward.

    Args:
      embeddings: array of shape [..., out_features].
      out_features: expected size of the last dimension.
      normalizer: None (default, identity), the string "l2" (fused, in-kernel
        L2 normalization along the feature axis), or an arbitrary JAX callable.
      head_normalize: config flag gating the normalizer (get_default_config).
      donate_buffer: set True ONLY when the caller donates `embeddings`
        (e.g. jax.jit(..., donate_argnums=...)); then the fused kernel aliases
        its output onto the input HBM buffer and no second copy is made.
        Without donation, aliasing would force XLA to insert a defensive copy
        (an extra full HBM read+write), so it is off by default.
    """
    if embeddings.shape[-1] != out_features:
        raise ValueError(
            'Expected embeddings with dimension {}, got {}'.format(
                out_features, embeddings.shape[-1]))

    effective_normalizer = normalizer if head_normalize else None

    if effective_normalizer is None:
        # Identity pass-through: eliding the kernel removes a full HBM
        # read + write (and the launch) for zero compute — the dominant win.
        return embeddings

    if effective_normalizer == "l2":
        feat = embeddings.shape[-1]
        orig_shape = embeddings.shape
        x2d = embeddings.reshape(-1, feat)
        out = _l2_normalize_pallas(x2d, donate_buffer=donate_buffer)
        return out.reshape(orig_shape)

    # TODO(synk): arbitrary external normalizer modules cannot be fused
    # generically into the kernel; apply them as plain JAX glue.
    return effective_normalizer(embeddings)


# ----------------------------------------------------------------------------
# Self-test.
# ----------------------------------------------------------------------------
if __name__ == "__main__":
    import warnings
    warnings.filterwarnings("ignore", message=".*donated.*")

    def ref_l2(x):
        x32 = x.astype(jnp.float32)
        n = x32 * jax.lax.rsqrt(jnp.sum(x32 * x32, axis=-1, keepdims=True) + _EPS)
        return n.astype(x.dtype)

    key = jax.random.PRNGKey(0)
    batch, out_features = 32, 32
    embeddings = jax.random.normal(key, (batch, out_features), dtype=jnp.float32)

    # 1) Default construction (normalizer=None): pure identity, no kernel.
    y_id = jax.block_until_ready(identity_embedder_forward(embeddings, out_features))
    assert y_id.shape == embeddings.shape and y_id.dtype == embeddings.dtype
    assert bool(jnp.all(y_id == embeddings))

    # 2) Fused L2 path, narrow feature width -> lane-packed kernel (feat=32, g=4).
    #    Tolerance leaves headroom for MXU f32 matmul precision.
    y_norm = jax.block_until_ready(
        identity_embedder_forward(embeddings, out_features, normalizer="l2"))
    assert y_norm.shape == embeddings.shape and y_norm.dtype == embeddings.dtype
    assert bool(jnp.allclose(y_norm, ref_l2(embeddings), rtol=5e-3, atol=5e-3))

    # 2b) bf16 packed path (sublane multiple = 16).
    x_bf16 = jax.random.normal(jax.random.PRNGKey(1), (64, 32), dtype=jnp.bfloat16)
    y_bf16 = jax.block_until_ready(
        identity_embedder_forward(x_bf16, 32, normalizer="l2"))
    assert y_bf16.dtype == jnp.bfloat16
    assert bool(jnp.allclose(y_bf16.astype(jnp.float32),
                             ref_l2(x_bf16).astype(jnp.float32),
                             rtol=2e-2, atol=2e-2))

    # 2c) Feature width >= 128 -> per-row kernel (no packing needed).
    x_mid = jax.random.normal(jax.random.PRNGKey(2), (16, 256), dtype=jnp.float32)
    y_mid = jax.block_until_ready(
        identity_embedder_forward(x_mid, 256, normalizer="l2"))
    assert bool(jnp.allclose(y_mid, ref_l2(x_mid), rtol=1e-6, atol=1e-6))

    # 2d) Wide-row guard path (feature-tiled two-pass kernel), exercised directly
    #     with a small feat_tile so it runs at tiny shapes (incl. a partial tile).
    x_wide = jax.random.normal(jax.random.PRNGKey(3), (16, 320), dtype=jnp.float32)
    y_wide = jax.block_until_ready(_l2_normalize_wide_pallas(x_wide, feat_tile=128))
    assert bool(jnp.allclose(y_wide, ref_l2(x_wide), rtol=1e-6, atol=1e-6))

    # 2e) Donated-buffer usage: the documented fast path (no defensive copy).
    donated_fwd = jax.jit(
        functools.partial(identity_embedder_forward, out_features=out_features,
                          normalizer="l2", donate_buffer=True),
        donate_argnums=(0,))
    y_don = jax.block_until_ready(donated_fwd(embeddings + 0.0))
    assert bool(jnp.allclose(y_don, ref_l2(embeddings), rtol=5e-3, atol=5e-3))

    # 3) head_normalize=False disables the normalizer (identity again).
    y_off = jax.block_until_ready(
        identity_embedder_forward(embeddings, out_features, normalizer="l2",
                                  head_normalize=False))
    assert bool(jnp.all(y_off == embeddings))

    # 4) Shape-check error path mirrors the PyTorch module.
    try:
        identity_embedder_forward(embeddings, out_features + 1)
        raise AssertionError("expected ValueError for mismatched dimension")
    except ValueError:
        pass

    print("KERNEL_OK")
</pallas_src>

<mosaic_0001>
module attributes {stable_mosaic.version = 11 : i64} {
  func.func @_l2_normalize_packed_kernel(%arg0: i32, %arg1: memref<8x128xf32, #tpu.memory_space<vmem>>, %arg2: memref<128x128xf32, #tpu.memory_space<vmem>>, %arg3: memref<8x128xf32, #tpu.memory_space<vmem>>) attributes {dimension_semantics = [#tpu.dimension_semantics<parallel>], iteration_bounds = array<i64: 1>, scalar_prefetch = 0 : i64, scratch_operands = 0 : i64, tpu.core_type = #tpu.core_type<tc>, window_params = [{transform_indices = @transform_0, window_bounds = array<i64: 8, 128>}, {pipeline_mode = #tpu.pipeline_mode<synchronous>, transform_indices = @transform_1, window_bounds = array<i64: 128, 128>}, {transform_indices = @transform_2, window_bounds = array<i64: 8, 128>}]} {
    %c0 = arith.constant 0 : index
    %c0_0 = arith.constant 0 : index
    %0 = vector.load %arg1[%c0, %c0_0] : memref<8x128xf32, #tpu.memory_space<vmem>>, vector<8x128xf32>
    %1 = arith.mulf %0, %0 : vector<8x128xf32>
    %c0_1 = arith.constant 0 : index
    %c0_2 = arith.constant 0 : index
    %2 = vector.load %arg2[%c0_1, %c0_2] : memref<128x128xf32, #tpu.memory_space<vmem>>, vector<128x128xf32>
    %cst = arith.constant dense<0.000000e+00> : vector<8x128xf32>
    %3 = tpu.matmul %1, %2, %cst {dimension_numbers = #tpu.dot_dimension_numbers<[1], [0], [0], [1], [0, 0, 1, 1], [], []>} : vector<8x128xf32>, vector<128x128xf32>, vector<8x128xf32> -> vector<8x128xf32>
    %cst_3 = arith.constant 9.99999996E-13 : f32
    %4 = vector.broadcast %cst_3 : f32 to vector<8x128xf32>
    %5 = arith.addf %3, %4 : vector<8x128xf32>
    %6 = math.rsqrt %5 : vector<8x128xf32>
    %7 = arith.mulf %0, %6 : vector<8x128xf32>
    %c0_4 = arith.constant 0 : index
    %c0_5 = arith.constant 0 : index
    %8 = vector.load %arg3[%c0_4, %c0_5] : memref<8x128xf32, #tpu.memory_space<vmem>>, vector<8x128xf32>
    tpu.vector_store %arg3[%c0_4, %c0_5], %7 {strides = array<i32>} : memref<8x128xf32, #tpu.memory_space<vmem>>, vector<8x128xf32>,
    return
  }
  func.func @transform_0(%arg0: i32) -> (i32, i32) {
    %c0_i32 = arith.constant 0 : i32
    %c0_i32_0 = arith.constant 0 : i32
    return %arg0, %c0_i32 : i32, i32
  }
  func.func @transform_1(%arg0: i32) -> (i32, i32) {
    %c0_i32 = arith.constant 0 : i32
    %c0_i32_0 = arith.constant 0 : i32
    %c0_i32_1 = arith.constant 0 : i32
    return %c0_i32, %c0_i32_0 : i32, i32
  }
  func.func @transform_2(%arg0: i32) -> (i32, i32) {
    %c0_i32 = arith.constant 0 : i32
    %c0_i32_0 = arith.constant 0 : i32
    return %arg0, %c0_i32 : i32, i32
  }
}

</mosaic_0001>

<bundles_post_ra>
// kernel: tpu_custom_call.1
= control target key start
LH: loop header
LB: loop body
LE: loop exit
PB: predicated region body
PF: predicated region fallthrough
CT: control target
= control target key end

     0   :  { %7 = vsyncpa [#allocation3], 0  ;;  %s369_s0 = inlined_call_operand.hbm [shape: f32[8,128], index: 0, kind: input, shape index: {}]   ;;  %s370_s1 = inlined_call_operand.hbm [shape: f32[128,128], index: 1, kind: input, shape index: {}]   ;;  %s371_s2 = inlined_call_operand.hbm [shape: f32[8,128], index: 2, kind: output, shape index: {}]  }
   0x1   :  { %8 = vsyncpa [#allocation6], 0 }
   0x2   :  { %9 = vsyncpa [#allocation4], 0  ;;  %s303_s9 = smov [#allocation2]   ;;  %s304_s11 = smov [#allocation5]  }
   0x3   :  { %s16_s10 = sshll.u32 %s303_s9, 4  ;;  %s25_s12 = sshll.u32 %s304_s11, 4  ;;  %s17_s10 = int_to_ptr.vmem [resolvable:$true] %s16_s10  ;;  %s326_s12 = int_to_ptr.vmem [resolvable:$true] %s25_s12 }
   0x4   :  { %s231_s15 = scalar_lea.hbm %s369_s0, 128 }
   0x5   :  { %p232_p0 = scmp.ne.s32.totalorder %s369_s0, %s231_s15  ;;  %p235_p1 = scmp.lt.u32.totalorder %s231_s15, %s369_s0 }
   0x7   :  { %p237_p2 = pnand %p235_p1, %p232_p0 }
   0x9   :  { %240 = shalt.err (!%p237_p2)
}
   0xa   :  { %s241_s20 = scalar_lea.vmem %s17_s10, 128  ;;  %p246_p4 = scmp.lt.s32.totalorder %s17_s10, %s17_s10 }
   0xb   :  { %p242_p3 = scmp.ne.s32.totalorder %s17_s10, %s241_s20  ;;  %p247_p5 = scmp.lt.s32.totalorder %s241_s20, %s241_s20 }
   0xd   :  { %p248_p6 = por %p247_p5, %p246_p4 }
   0xf   :  { %p249_p7 = pnand %p248_p6, %p242_p3 }
  0x11   :  { %252 = shalt.err (!%p249_p7)
}
  0x12   :  { %19 = dma.hbm_to_vmem [thread:$0]  %s369_s0, 128, %s17_s10, [#allocation3]  }
  0x13   :  { %s253_s25 = scalar_lea.hbm %s370_s1, 2048 }
  0x14   :  { %p254_p8 = scmp.ne.s32.totalorder %s370_s1, %s253_s25  ;;  %p257_p9 = scmp.lt.u32.totalorder %s253_s25, %s370_s1 }
  0x16   :  { %p259_p10 = pnand %p257_p9, %p254_p8 }
  0x18   :  { %262 = shalt.err (!%p259_p10)
}
  0x19   :  { %s263_s30 = scalar_lea.vmem %s326_s12, 2048  ;;  %p268_p12 = scmp.lt.s32.totalorder %s326_s12, %s326_s12 }
  0x1a   :  { %p264_p11 = scmp.ne.s32.totalorder %s326_s12, %s263_s30  ;;  %p269_p13 = scmp.lt.s32.totalorder %s263_s30, %s263_s30 }
  0x1c   :  { %p270_p0 = por %p269_p13, %p268_p12 }
  0x1e   :  { %p271_p1 = pnand %p270_p0, %p264_p11 }
  0x20   :  { %274 = shalt.err (!%p271_p1)
}
  0x21   :  { %s305_s0 = smov 128   ;;  %s306_s3 = smov 8  }
  0x22   :  { %31 = dma.hbm_to_vmem [thread:$0]  %s370_s1, 2048, %s326_s12, [#allocation6], %s305_s0, %s305_s0, %s306_s3  }
  0x23   :  { %297 = dma.done.wait [#allocation3], 128  }
  0x24   :  { %298 = vsyncadd [#allocation3], 4294967168 }
  0x25   :  { %299 = dma.done.wait [#allocation6], 2048  }
  0x26   :  { %300 = vsyncadd [#allocation6], 4294965248  ;;  %v307_v0 = vmov 0.0|0.0   ;;  %vm308_vm0 = vmmov 0   ;;  %v309_v1 = vmov 0.0   ;;  %v40_v2 = vld [vmem:[#allocation5] sm:$0xff] }
  0x27   :  { %197 = vmatprep.subr.bf16.mxu0 %v307_v0  ;;  %194 = vmatprep.mubr.msk.f32.mxu0 %vm308_vm0, %v309_v1  ;;  %v41_v3 = vld [vmem:[#allocation5 + $0x8] sm:$0xff]  ;;  %v42_v4 = vld [vmem:[#allocation5 + $0x10] sm:$0xff]  ;;  %v43_v6 = vld [vmem:[#allocation5 + $0x18] sm:$0xff]  ;;  %s310_s1 = smov [#allocation7]  }
  0x28   :  { %v198_v5 = vpack.c.bf16 %v41_v3, %v40_v2  ;;  %v201_v7 = vpack.c.bf16 %v43_v6, %v42_v4  ;;  %v44_v8 = vld [vmem:[#allocation5 + $0x20] sm:$0xff]  ;;  %v45_v9 = vld [vmem:[#allocation5 + $0x28] sm:$0xff]  ;;  %v46_v11 = vld [vmem:[#allocation5 + $0x30] sm:$0xff]  ;;  %s135_s6 = sshll.u32 %s310_s1, 4  ;;  %s136_s6 = int_to_ptr.vmem [resolvable:$true] %s135_s6 }
  0x29   :  { %v204_v10 = vpack.c.bf16 %v45_v9, %v44_v8  ;;  %v47_v12 = vld [vmem:[#allocation5 + $0x38] sm:$0xff]  ;;  %v48_v14 = vld [vmem:[#allocation5 + $0x40] sm:$0xff]  ;;  %v49_v15 = vld [vmem:[#allocation5 + $0x48] sm:$0xff]  ;;  %s275_s7 = scalar_lea.vmem %s136_s6, 128  ;;  %p280_p3 = scmp.lt.s32.totalorder %s136_s6, %s136_s6 }
  0x2a   :  { %199 = vmatpush3.bf16.msra.mxu0 %v198_v5  ;;  %v207_v13 = vpack.c.bf16 %v47_v12, %v46_v11  ;;  %v210_v16 = vpack.c.bf16 %v49_v15, %v48_v14  ;;  %v50_v17 = vld [vmem:[#allocation5 + $0x50] sm:$0xff]  ;;  %v51_v18 = vld [vmem:[#allocation5 + $0x58] sm:$0xff]  ;;  %v52_v20 = vld [vmem:[#allocation5 + $0x60] sm:$0xff]  ;;  %p276_p2 = scmp.ne.s32.totalorder %s136_s6, %s275_s7  ;;  %p281_p4 = scmp.lt.s32.totalorder %s275_s7, %s275_s7 }
  0x2b   :  { %200 = vmatprep.subr.bf16.mxu0 %v307_v0  ;;  %v213_v19 = vpack.c.bf16 %v51_v18, %v50_v17  ;;  %v53_v21 = vld [vmem:[#allocation5 + $0x68] sm:$0xff]  ;;  %v54_v23 = vld [vmem:[#allocation5 + $0x70] sm:$0xff]  ;;  %v55_v24 = vld [vmem:[#allocation5 + $0x78] sm:$0xff] }
  0x2c   :  { %v216_v22 = vpack.c.bf16 %v53_v21, %v52_v20  ;;  %v219_v25 = vpack.c.bf16 %v55_v24, %v54_v23  ;;  %v38_v26 = vld [vmem:[#allocation2] sm:$0xff]  ;;  %p282_p5 = por %p281_p4, %p280_p3 }
  0x2d   :  { %v39_v27 = vmul.f32 %v38_v26, %v38_v26 }
  0x2e   :  { %202 = vmatpush3.bf16.msra.mxu0 %v201_v7  ;;  %p283_p6 = pnand %p282_p5, %p276_p2 }
  0x2f   :  { %203 = vmatprep.subr.bf16.mxu0 %v307_v0 }
  0x32   :  { %205 = vmatpush3.bf16.msra.mxu0 %v204_v10 }
  0x33   :  { %206 = vmatprep.subr.bf16.mxu0 %v307_v0 }
  0x36   :  { %208 = vmatpush3.bf16.msra.mxu0 %v207_v13 }
  0x37   :  { %209 = vmatprep.subr.bf16.mxu0 %v307_v0 }
  0x3a   :  { %211 = vmatpush3.bf16.msra.mxu0 %v210_v16 }
  0x3b   :  { %212 = vmatprep.subr.bf16.mxu0 %v307_v0 }
  0x3e   :  { %214 = vmatpush3.bf16.msra.mxu0 %v213_v19 }
  0x3f   :  { %215 = vmatprep.subr.bf16.mxu0 %v307_v0 }
  0x42   :  { %217 = vmatpush3.bf16.msra.mxu0 %v216_v22 }
  0x43   :  { %218 = vmatprep.subr.bf16.mxu0 %v307_v0 }
  0x46   :  { %220 = vmatpush3.bf16.msra.mxu0 %v219_v25 }
  0x49   :  { %195 = vmatmul.mubr.f32.vlgmr.msra.gmra.mrb[0].mxu0 %v39_v27 }
 0x11c   :  { %v122_v28 = vpop.f32.mrb[0].mxu0 }
 0x11d   :  { %v123_v29 = vadd.f32 1e-12, %v122_v28  ;;  %v196_v30 = vpop.f32.mrb[1].mxu0 }
 0x11f   :  { %229 = vrsqrt.f32 %v123_v29 }
 0x129   :  { %v230_v31 = vpop.eup %229 }
 0x12a   :  { %v127_v32 = vmul.f32 %v230_v31, %v38_v26 }
 0x12c   :  { %128 = vst [vmem:[#allocation7] sm:$0xff] %v127_v32 }
 0x12d   :  { %286 = shalt.err (!%p283_p6)
}
 0x12e   :  { %s287_s10 = scalar_lea.hbm %s371_s2, 128 }
 0x12f   :  { %p288_p7 = scmp.ne.s32.totalorder %s371_s2, %s287_s10  ;;  %p291_p8 = scmp.lt.u32.totalorder %s287_s10, %s371_s2 }
 0x131   :  { %p293_p9 = pnand %p291_p8, %p288_p7 }
 0x133   :  { %296 = shalt.err (!%p293_p9)
}
 0x134   :  { %138 = dma.vmem_to_hbm [thread:$0]  %s136_s6, 128, %s371_s2, [#allocation4]  }
 0x135   :  { %301 = dma.done.wait [#allocation4], 128  }
 0x136   :  { %302 = vsyncadd [#allocation4], 4294967168 }
 0x137   :  { %142 = vsyncpa [#allocation3], 1 }
 0x138   :  { %143 = vsyncpa [#allocation6], 1 }
 0x139   :  { %144 = vsyncpa [#allocation4], 1 }

</bundles_post_ra>
